<compile_context>
chip_gen: v7x
topology: tpu7x:2x2x1
jax: 0.10.0
libtpu: 0.0.40
codegen_flags: <defaults>
</compile_context>

<pallas_src>
import functools

import jax
import jax.numpy as jnp
from jax import lax
from jax.experimental import pallas as pl
from jax.experimental.pallas import tpu as pltpu


# ------------------------- tile-size selection helpers ---------------------- #
_LANE = 128     # lane width (last dim)
_SUBLANE = 8    # f32 sublane width (second-to-last dim)


def _pick_tile(dim, target, align):
    """Largest tile <= target that is a multiple of `align` and divides `dim`.
    Falls back to the full dimension (no tiling on this axis) when impossible,
    which keeps the BlockSpec legal (block == full array dim)."""
    if dim <= target or dim % align != 0:
        return dim
    t = (target // align) * align
    while t >= align:
        if dim % t == 0:
            return t
        t -= align
    return dim


# ---------------- batched, tiled linear:  y[p] = x[p] @ W[p] + b[p] ---------- #
def _linear_kernel(x_ref, w_ref, b_ref, o_ref, acc_ref):
    # grid = (P, M/tm, N/tn, K/tk); reduction axis K is last ("arbitrary").
    kk = pl.program_id(3)

    @pl.when(kk == 0)
    def _():
        acc_ref[...] = jnp.zeros_like(acc_ref)

    acc_ref[...] += jnp.dot(
        x_ref[...], w_ref[...], preferred_element_type=jnp.float32
    )

    @pl.when(kk == pl.num_programs(3) - 1)
    def _():
        o_ref[...] = (acc_ref[...] + b_ref[...]).astype(o_ref.dtype)


def batched_linear(x3, w3, b3, *, tm_target=256, tn_target=256, tk_target=512):
    """x3: (P, M, K), w3: (P, K, N) (already transposed), b3: (P, 1, N)."""
    P, M, K = x3.shape
    N = w3.shape[-1]

    tm = _pick_tile(M, tm_target, _SUBLANE)
    tn = _pick_tile(N, tn_target, _LANE)
    tk = _pick_tile(K, tk_target, _LANE)

    grid = (P, M // tm, N // tn, K // tk)
    cost = pl.CostEstimate(
        flops=2 * P * M * N * K,
        transcendentals=0,
        bytes_accessed=4 * (P * M * K + P * K * N + P * M * N + P * N),
    )
    return pl.pallas_call(
        _linear_kernel,
        out_shape=jax.ShapeDtypeStruct((P, M, N), x3.dtype),
        grid_spec=pltpu.PrefetchScalarGridSpec(
            num_scalar_prefetch=0,
            grid=grid,
            in_specs=[
                pl.BlockSpec((None, tm, tk), lambda p, i, j, k: (p, i, k)),
                pl.BlockSpec((None, tk, tn), lambda p, i, j, k: (p, k, j)),
                pl.BlockSpec((None, 1, tn), lambda p, i, j, k: (p, 0, j)),
            ],
            out_specs=pl.BlockSpec((None, tm, tn), lambda p, i, j, k: (p, i, j)),
            scratch_shapes=[pltpu.VMEM((tm, tn), jnp.float32)],
        ),
        compiler_params=pltpu.CompilerParams(
            dimension_semantics=("parallel", "parallel", "parallel", "arbitrary"),
        ),
        cost_estimate=cost,
    )(x3, w3, b3)


# --------------------- Scaled dot-product attention kernel ----------------- #
def _attn_kernel(q_ref, k_ref, v_ref, o_ref):
    # One batch element per grid step; all heads processed together so the MXU
    # sees one batched contraction instead of B*H tiny per-head matmuls.
    q = q_ref[...]          # (H, L, Dh)
    k = k_ref[...]          # (H, L, Dh)
    v = v_ref[...]          # (H, L, Dh)
    scale = q.shape[-1] ** -0.5

    # s[h, i, j] = sum_d q[h, i, d] * k[h, j, d]   (no materialized k.T)
    s = lax.dot_general(
        q, k, (((2,), (2,)), ((0,), (0,))),
        preferred_element_type=jnp.float32,
    ) * scale                                           # (H, L, L)

    # numerically-stable softmax; keep exp/max/sum in f32.
    m = jnp.max(s, axis=-1, keepdims=True)
    p = jnp.exp(s - m)
    l = jnp.sum(p, axis=-1, keepdims=True)              # (H, L, 1)

    # Normalize AFTER the PV matmul: L*Dh multiplies instead of L*L divides,
    # with the reciprocal on the EUP slot (effectively free).
    o = lax.dot_general(
        p, v, (((2,), (1,)), ((0,), (0,))),
        preferred_element_type=jnp.float32,
    )                                                    # (H, L, Dh)
    o_ref[...] = (o * pl.reciprocal(l, approx=True)).astype(o_ref.dtype)


def scale_dot_product_attention(q4, k4, v4):
    B, H, L, Dh = q4.shape
    spec = pl.BlockSpec((None, H, L, Dh), lambda b: (b, 0, 0, 0))
    cost = pl.CostEstimate(
        flops=4 * B * H * L * L * Dh,
        transcendentals=B * H * L * L,
        bytes_accessed=4 * 4 * B * H * L * Dh,
    )
    # TODO(synk): for large L, restructure flash-style (KV grid axis +
    # online-softmax scratch) so the (L, L) score tile never materializes.
    return pl.pallas_call(
        _attn_kernel,
        out_shape=jax.ShapeDtypeStruct((B, H, L, Dh), q4.dtype),
        grid_spec=pltpu.PrefetchScalarGridSpec(
            num_scalar_prefetch=0,
            grid=(B,),
            in_specs=[spec, spec, spec],
            out_specs=spec,
        ),
        compiler_params=pltpu.CompilerParams(
            dimension_semantics=("parallel",),
        ),
        cost_estimate=cost,
    )(q4, k4, v4)


# ------------------------------- Full module -------------------------------- #
def custom_multi_head_attention(q, k, v, params, n_head):
    """Forward pass of CustomMultiHeadAttention (mask=None, dropout=0)."""
    B, L, D = q.shape
    assert D % n_head == 0
    Dh = D // n_head
    M = B * L

    # Q/K/V projections share a single tiled GEMM grid (one pallas_call) via a
    # stacked leading axis; q, k, v may be different tensors (cross-attention).
    x3 = jnp.stack([q.reshape(M, D), k.reshape(M, D), v.reshape(M, D)], axis=0)
    w3 = jnp.stack([params["wq_t"], params["wk_t"], params["wv_t"]], axis=0)
    b3 = jnp.stack([params["bq"], params["bk"], params["bv"]], axis=0)[:, None, :]
    qkv = batched_linear(x3, w3, b3)                     # (3, M, D)

    # split(): PyTorch .view(B, H, L, Dh) is a raw row-major reinterpretation,
    # i.e. exactly jnp.reshape (layout glue, not compute).
    q4 = qkv[0].reshape(B, n_head, L, Dh)
    k4 = qkv[1].reshape(B, n_head, L, Dh)
    v4 = qkv[2].reshape(B, n_head, L, Dh)

    out4 = scale_dot_product_attention(q4, k4, v4)

    # concat(): inverse view, then output projection (same tiled GEMM, P=1).
    out2d = out4.reshape(M, D)
    out = batched_linear(
        out2d[None], params["wc_t"][None], params["bc"][None, None, :]
    )[0]
    # dropout rate is 0 in the module's __init__ -> identity.
    return out.reshape(B, L, D)


# ------------------------- Deterministic param init ------------------------- #
def init_params(key, dim):
    bound = 1.0 / (dim ** 0.5)
    keys = jax.random.split(key, 8)

    def u(k, shape):
        return jax.random.uniform(k, shape, jnp.float32, -bound, bound)

    # PyTorch nn.Linear stores W as (out, in); we pre-transpose to (in, out).
    return {
        "wq_t": u(keys[0], (dim, dim)).T, "bq": u(keys[1], (dim,)),
        "wk_t": u(keys[2], (dim, dim)).T, "bk": u(keys[3], (dim,)),
        "wv_t": u(keys[4], (dim, dim)).T, "bv": u(keys[5], (dim,)),
        "wc_t": u(keys[6], (dim, dim)).T, "bc": u(keys[7], (dim,)),
    }


# ------------------------------ Pure-JAX reference --------------------------- #
def _reference(q, k, v, params, n_head):
    B, L, D = q.shape
    Dh = D // n_head
    qp = q @ params["wq_t"] + params["bq"]
    kp = k @ params["wk_t"] + params["bk"]
    vp = v @ params["wv_t"] + params["bv"]
    q4 = qp.reshape(B, n_head, L, Dh)
    k4 = kp.reshape(B, n_head, L, Dh)
    v4 = vp.reshape(B, n_head, L, Dh)
    s = jnp.einsum("bhid,bhjd->bhij", q4, k4) * (Dh ** -0.5)
    attn = jax.nn.softmax(s, axis=-1)
    o4 = jnp.einsum("bhij,bhjd->bhid", attn, v4)
    out = o4.reshape(B, L, D)
    return out @ params["wc_t"] + params["bc"]


if __name__ == "__main__":
    B, L, D, H = 2, 8, 32, 4

    key = jax.random.PRNGKey(0)
    kq, kk, kv, kp = jax.random.split(key, 4)
    q = jax.random.normal(kq, (B, L, D), jnp.float32)
    k = jax.random.normal(kk, (B, L, D), jnp.float32)
    v = jax.random.normal(kv, (B, L, D), jnp.float32)
    params = init_params(kp, D)

    mha = jax.jit(functools.partial(custom_multi_head_attention, n_head=H))
    out = mha(q, k, v, params)
    out = jax.block_until_ready(out)

    ref = _reference(q, k, v, params, H)
    assert out.shape == (B, L, D)
    # Tolerance slightly loosened vs. exact f32 because the attention output is
    # normalized with the EUP approximate reciprocal (pl.reciprocal approx=True).
    assert jnp.allclose(out, ref, atol=2e-3, rtol=2e-3)

    print("KERNEL_OK")
</pallas_src>

<mosaic_0001>
module attributes {stable_mosaic.version = 11 : i64} {
  func.func @_attn_kernel(%arg0: i32, %arg1: memref<1x4x8x8xf32, #tpu.memory_space<vmem>>, %arg2: memref<1x4x8x8xf32, #tpu.memory_space<vmem>>, %arg3: memref<1x4x8x8xf32, #tpu.memory_space<vmem>>, %arg4: memref<1x4x8x8xf32, #tpu.memory_space<vmem>>) attributes {dimension_semantics = [#tpu.dimension_semantics<parallel>], iteration_bounds = array<i64: 2>, scalar_prefetch = 0 : i64, scratch_operands = 0 : i64, tpu.core_type = #tpu.core_type<tc>, window_params = [{transform_indices = @transform_0, window_bounds = array<i64: 1, 4, 8, 8>}, {transform_indices = @transform_1, window_bounds = array<i64: 1, 4, 8, 8>}, {transform_indices = @transform_2, window_bounds = array<i64: 1, 4, 8, 8>}, {transform_indices = @transform_3, window_bounds = array<i64: 1, 4, 8, 8>}]} {
    %c0 = arith.constant 0 : index
    %c0_0 = arith.constant 0 : index
    %c0_1 = arith.constant 0 : index
    %c0_2 = arith.constant 0 : index
    %0 = vector.load %arg1[%c0, %c0_0, %c0_1, %c0_2] : memref<1x4x8x8xf32, #tpu.memory_space<vmem>>, vector<1x4x8x8xf32>
    %1 = vector.shape_cast %0 : vector<1x4x8x8xf32> to vector<4x8x8xf32>
    %c0_3 = arith.constant 0 : index
    %c0_4 = arith.constant 0 : index
    %c0_5 = arith.constant 0 : index
    %c0_6 = arith.constant 0 : index
    %2 = vector.load %arg2[%c0_3, %c0_4, %c0_5, %c0_6] : memref<1x4x8x8xf32, #tpu.memory_space<vmem>>, vector<1x4x8x8xf32>
    %3 = vector.shape_cast %2 : vector<1x4x8x8xf32> to vector<4x8x8xf32>
    %c0_7 = arith.constant 0 : index
    %c0_8 = arith.constant 0 : index
    %c0_9 = arith.constant 0 : index
    %c0_10 = arith.constant 0 : index
    %4 = vector.load %arg3[%c0_7, %c0_8, %c0_9, %c0_10] : memref<1x4x8x8xf32, #tpu.memory_space<vmem>>, vector<1x4x8x8xf32>
    %5 = vector.shape_cast %4 : vector<1x4x8x8xf32> to vector<4x8x8xf32>
    %cst = arith.constant dense<0.000000e+00> : vector<4x8x8xf32>
    %6 = tpu.matmul %1, %3, %cst {dimension_numbers = #tpu.dot_dimension_numbers<[2], [2], [1], [1], [0, 0, 0, 1, 1, 1], [0], [0]>} : vector<4x8x8xf32>, vector<4x8x8xf32>, vector<4x8x8xf32> -> vector<4x8x8xf32>
    %cst_11 = arith.constant 0.353553385 : f32
    %7 = vector.broadcast %cst_11 : f32 to vector<4x8x8xf32>
    %8 = arith.mulf %6, %7 : vector<4x8x8xf32>
    %cst_12 = arith.constant dense<0xFF800000> : vector<4x8xf32>
    %9 = vector.multi_reduction <maximumf>, %8, %cst_12 [2] : vector<4x8x8xf32> to vector<4x8xf32>
    %10 = vector.shape_cast %9 : vector<4x8xf32> to vector<4x8x1xf32>
    %11 = vector.broadcast %10 : vector<4x8x1xf32> to vector<4x8x8xf32>
    %12 = arith.subf %8, %11 : vector<4x8x8xf32>
    %13 = math.exp %12 : vector<4x8x8xf32>
    %cst_13 = arith.constant dense<0.000000e+00> : vector<4x8xf32>
    %14 = vector.multi_reduction <add>, %13, %cst_13 [2] : vector<4x8x8xf32> to vector<4x8xf32>
    %15 = vector.shape_cast %14 : vector<4x8xf32> to vector<4x8x1xf32>
    %cst_14 = arith.constant dense<0.000000e+00> : vector<4x8x8xf32>
    %16 = tpu.matmul %13, %5, %cst_14 {dimension_numbers = #tpu.dot_dimension_numbers<[2], [1], [1], [2], [0, 0, 0, 1, 1, 2], [0], [0]>} : vector<4x8x8xf32>, vector<4x8x8xf32>, vector<4x8x8xf32> -> vector<4x8x8xf32>
    %17 = tpu.reciprocal %15 {approx = true} : vector<4x8x1xf32> -> vector<4x8x1xf32>
    %18 = vector.broadcast %17 : vector<4x8x1xf32> to vector<4x8x8xf32>
    %19 = arith.mulf %16, %18 : vector<4x8x8xf32>
    %c0_15 = arith.constant 0 : index
    %c0_16 = arith.constant 0 : index
    %c0_17 = arith.constant 0 : index
    %c0_18 = arith.constant 0 : index
    %20 = vector.load %arg4[%c0_15, %c0_16, %c0_17, %c0_18] : memref<1x4x8x8xf32, #tpu.memory_space<vmem>>, vector<1x4x8x8xf32>
    %21 = vector.shape_cast %20 : vector<1x4x8x8xf32> to vector<4x8x8xf32>
    %22 = vector.shape_cast %19 : vector<4x8x8xf32> to vector<1x4x8x8xf32>
    tpu.vector_store %arg4[%c0_15, %c0_16, %c0_17, %c0_18], %22 {strides = array<i32>} : memref<1x4x8x8xf32, #tpu.memory_space<vmem>>, vector<1x4x8x8xf32>,
    return
  }
  func.func @transform_0(%arg0: i32) -> (i32, i32, i32, i32) {
    %c0_i32 = arith.constant 0 : i32
    %c0_i32_0 = arith.constant 0 : i32
    %c0_i32_1 = arith.constant 0 : i32
    %c0_i32_2 = arith.constant 0 : i32
    return %arg0, %c0_i32, %c0_i32_0, %c0_i32_1 : i32, i32, i32, i32
  }
  func.func @transform_1(%arg0: i32) -> (i32, i32, i32, i32) {
    %c0_i32 = arith.constant 0 : i32
    %c0_i32_0 = arith.constant 0 : i32
    %c0_i32_1 = arith.constant 0 : i32
    %c0_i32_2 = arith.constant 0 : i32
    return %arg0, %c0_i32, %c0_i32_0, %c0_i32_1 : i32, i32, i32, i32
  }
  func.func @transform_2(%arg0: i32) -> (i32, i32, i32, i32) {
    %c0_i32 = arith.constant 0 : i32
    %c0_i32_0 = arith.constant 0 : i32
    %c0_i32_1 = arith.constant 0 : i32
    %c0_i32_2 = arith.constant 0 : i32
    return %arg0, %c0_i32, %c0_i32_0, %c0_i32_1 : i32, i32, i32, i32
  }
  func.func @transform_3(%arg0: i32) -> (i32, i32, i32, i32) {
    %c0_i32 = arith.constant 0 : i32
    %c0_i32_0 = arith.constant 0 : i32
    %c0_i32_1 = arith.constant 0 : i32
    %c0_i32_2 = arith.constant 0 : i32
    return %arg0, %c0_i32, %c0_i32_0, %c0_i32_1 : i32, i32, i32, i32
  }
}

module attributes {stable_mosaic.version = 11 : i64} {
  func.func @_linear_kernel(%arg0: i32, %arg1: i32, %arg2: i32, %arg3: i32, %arg4: memref<1x16x32xf32, #tpu.memory_space<vmem>>, %arg5: memref<1x32x32xf32, #tpu.memory_space<vmem>>, %arg6: memref<1x1x32xf32, #tpu.memory_space<vmem>>, %arg7: memref<1x16x32xf32, #tpu.memory_space<vmem>>, %arg8: memref<16x32xf32, #tpu.memory_space<vmem>>) attributes {dimension_semantics = [#tpu.dimension_semantics<parallel>, #tpu.dimension_semantics<parallel>, #tpu.dimension_semantics<parallel>, #tpu.dimension_semantics<arbitrary>], iteration_bounds = array<i64: 3, 1, 1, 1>, scalar_prefetch = 0 : i64, scratch_operands = 1 : i64, tpu.core_type = #tpu.core_type<tc>, window_params = [{transform_indices = @transform_0, window_bounds = array<i64: 1, 16, 32>}, {transform_indices = @transform_1, window_bounds = array<i64: 1, 32, 32>}, {transform_indices = @transform_2, window_bounds = array<i64: 1, 1, 32>}, {transform_indices = @transform_3, window_bounds = array<i64: 1, 16, 32>}]} {
    %c0_i32 = arith.constant 0 : i32
    %0 = arith.cmpi eq, %arg3, %c0_i32 : i32
    %1 = arith.extui %0 : i1 to i32
    %c0_i32_0 = arith.constant 0 : i32
    %2 = arith.cmpi ne, %1, %c0_i32_0 : i32
    scf.if %2 {
      %cst_12 = arith.constant 0.000000e+00 : f32
      %14 = vector.broadcast %cst_12 : f32 to vector<16x32xf32>
      %c0_13 = arith.constant 0 : index
      %c0_14 = arith.constant 0 : index
      %15 = vector.load %arg8[%c0_13, %c0_14] : memref<16x32xf32, #tpu.memory_space<vmem>>, vector<16x32xf32>
      tpu.vector_store %arg8[%c0_13, %c0_14], %14 {strides = array<i32>} : memref<16x32xf32, #tpu.memory_space<vmem>>, vector<16x32xf32>,
    } else {
    }
    %c0 = arith.constant 0 : index
    %c0_1 = arith.constant 0 : index
    %3 = vector.load %arg8[%c0, %c0_1] : memref<16x32xf32, #tpu.memory_space<vmem>>, vector<16x32xf32>
    %c0_2 = arith.constant 0 : index
    %c0_3 = arith.constant 0 : index
    %c0_4 = arith.constant 0 : index
    %4 = vector.load %arg4[%c0_2, %c0_3, %c0_4] : memref<1x16x32xf32, #tpu.memory_space<vmem>>, vector<1x16x32xf32>
    %5 = vector.shape_cast %4 : vector<1x16x32xf32> to vector<16x32xf32>
    %c0_5 = arith.constant 0 : index
    %c0_6 = arith.constant 0 : index
    %c0_7 = arith.constant 0 : index
    %6 = vector.load %arg5[%c0_5, %c0_6, %c0_7] : memref<1x32x32xf32, #tpu.memory_space<vmem>>, vector<1x32x32xf32>
    %7 = vector.shape_cast %6 : vector<1x32x32xf32> to vector<32x32xf32>
    %cst = arith.constant dense<0.000000e+00> : vector<16x32xf32>
    %8 = tpu.matmul %5, %7, %cst {dimension_numbers = #tpu.dot_dimension_numbers<[1], [0], [0], [1], [0, 0, 1, 1], [], []>} : vector<16x32xf32>, vector<32x32xf32>, vector<16x32xf32> -> vector<16x32xf32>
    %9 = arith.addf %3, %8 : vector<16x32xf32>
    %c0_8 = arith.constant 0 : index
    %c0_9 = arith.constant 0 : index
    %10 = vector.load %arg8[%c0_8, %c0_9] : memref<16x32xf32, #tpu.memory_space<vmem>>, vector<16x32xf32>
    tpu.vector_store %arg8[%c0_8, %c0_9], %9 {strides = array<i32>} : memref<16x32xf32, #tpu.memory_space<vmem>>, vector<16x32xf32>,
    %c0_i32_10 = arith.constant 0 : i32
    %11 = arith.cmpi eq, %arg3, %c0_i32_10 : i32
    %12 = arith.extui %11 : i1 to i32
    %c0_i32_11 = arith.constant 0 : i32
    %13 = arith.cmpi ne, %12, %c0_i32_11 : i32
    scf.if %13 {
      %c0_12 = arith.constant 0 : index
      %c0_13 = arith.constant 0 : index
      %14 = vector.load %arg8[%c0_12, %c0_13] : memref<16x32xf32, #tpu.memory_space<vmem>>, vector<16x32xf32>
      %c0_14 = arith.constant 0 : index
      %c0_15 = arith.constant 0 : index
      %c0_16 = arith.constant 0 : index
      %15 = vector.load %arg6[%c0_14, %c0_15, %c0_16] : memref<1x1x32xf32, #tpu.memory_space<vmem>>, vector<1x1x32xf32>
      %16 = vector.shape_cast %15 : vector<1x1x32xf32> to vector<1x32xf32>
      %17 = vector.broadcast %16 : vector<1x32xf32> to vector<16x32xf32>
      %18 = arith.addf %14, %17 : vector<16x32xf32>
      %c0_17 = arith.constant 0 : index
      %c0_18 = arith.constant 0 : index
      %c0_19 = arith.constant 0 : index
      %19 = vector.load %arg7[%c0_17, %c0_18, %c0_19] : memref<1x16x32xf32, #tpu.memory_space<vmem>>, vector<1x16x32xf32>
      %20 = vector.shape_cast %19 : vector<1x16x32xf32> to vector<16x32xf32>
      %21 = vector.shape_cast %18 : vector<16x32xf32> to vector<1x16x32xf32>
      tpu.vector_store %arg7[%c0_17, %c0_18, %c0_19], %21 {strides = array<i32>} : memref<1x16x32xf32, #tpu.memory_space<vmem>>, vector<1x16x32xf32>,
    } else {
    }
    return
  }
  func.func @transform_0(%arg0: i32, %arg1: i32, %arg2: i32, %arg3: i32) -> (i32, i32, i32) {
    %c0_i32 = arith.constant 0 : i32
    return %arg0, %arg1, %arg3 : i32, i32, i32
  }
  func.func @transform_1(%arg0: i32, %arg1: i32, %arg2: i32, %arg3: i32) -> (i32, i32, i32) {
    %c0_i32 = arith.constant 0 : i32
    return %arg0, %arg3, %arg2 : i32, i32, i32
  }
  func.func @transform_2(%arg0: i32, %arg1: i32, %arg2: i32, %arg3: i32) -> (i32, i32, i32) {
    %c0_i32 = arith.constant 0 : i32
    %c0_i32_0 = arith.constant 0 : i32
    return %arg0, %c0_i32, %arg2 : i32, i32, i32
  }
  func.func @transform_3(%arg0: i32, %arg1: i32, %arg2: i32, %arg3: i32) -> (i32, i32, i32) {
    %c0_i32 = arith.constant 0 : i32
    return %arg0, %arg1, %arg2 : i32, i32, i32
  }
}

module attributes {stable_mosaic.version = 11 : i64} {
  func.func @_linear_kernel(%arg0: i32, %arg1: i32, %arg2: i32, %arg3: i32, %arg4: memref<1x16x32xf32, #tpu.memory_space<vmem>>, %arg5: memref<1x32x32xf32, #tpu.memory_space<vmem>>, %arg6: memref<1x1x32xf32, #tpu.memory_space<vmem>>, %arg7: memref<1x16x32xf32, #tpu.memory_space<vmem>>, %arg8: memref<16x32xf32, #tpu.memory_space<vmem>>) attributes {dimension_semantics = [#tpu.dimension_semantics<parallel>, #tpu.dimension_semantics<parallel>, #tpu.dimension_semantics<parallel>, #tpu.dimension_semantics<arbitrary>], iteration_bounds = array<i64: 1, 1, 1, 1>, scalar_prefetch = 0 : i64, scratch_operands = 1 : i64, tpu.core_type = #tpu.core_type<tc>, window_params = [{transform_indices = @transform_0, window_bounds = array<i64: 1, 16, 32>}, {transform_indices = @transform_1, window_bounds = array<i64: 1, 32, 32>}, {transform_indices = @transform_2, window_bounds = array<i64: 1, 1, 32>}, {transform_indices = @transform_3, window_bounds = array<i64: 1, 16, 32>}]} {
    %c0_i32 = arith.constant 0 : i32
    %0 = arith.cmpi eq, %arg3, %c0_i32 : i32
    %1 = arith.extui %0 : i1 to i32
    %c0_i32_0 = arith.constant 0 : i32
    %2 = arith.cmpi ne, %1, %c0_i32_0 : i32
    scf.if %2 {
      %cst_12 = arith.constant 0.000000e+00 : f32
      %14 = vector.broadcast %cst_12 : f32 to vector<16x32xf32>
      %c0_13 = arith.constant 0 : index
      %c0_14 = arith.constant 0 : index
      %15 = vector.load %arg8[%c0_13, %c0_14] : memref<16x32xf32, #tpu.memory_space<vmem>>, vector<16x32xf32>
      tpu.vector_store %arg8[%c0_13, %c0_14], %14 {strides = array<i32>} : memref<16x32xf32, #tpu.memory_space<vmem>>, vector<16x32xf32>,
    } else {
    }
    %c0 = arith.constant 0 : index
    %c0_1 = arith.constant 0 : index
    %3 = vector.load %arg8[%c0, %c0_1] : memref<16x32xf32, #tpu.memory_space<vmem>>, vector<16x32xf32>
    %c0_2 = arith.constant 0 : index
    %c0_3 = arith.constant 0 : index
    %c0_4 = arith.constant 0 : index
    %4 = vector.load %arg4[%c0_2, %c0_3, %c0_4] : memref<1x16x32xf32, #tpu.memory_space<vmem>>, vector<1x16x32xf32>
    %5 = vector.shape_cast %4 : vector<1x16x32xf32> to vector<16x32xf32>
    %c0_5 = arith.constant 0 : index
    %c0_6 = arith.constant 0 : index
    %c0_7 = arith.constant 0 : index
    %6 = vector.load %arg5[%c0_5, %c0_6, %c0_7] : memref<1x32x32xf32, #tpu.memory_space<vmem>>, vector<1x32x32xf32>
    %7 = vector.shape_cast %6 : vector<1x32x32xf32> to vector<32x32xf32>
    %cst = arith.constant dense<0.000000e+00> : vector<16x32xf32>
    %8 = tpu.matmul %5, %7, %cst {dimension_numbers = #tpu.dot_dimension_numbers<[1], [0], [0], [1], [0, 0, 1, 1], [], []>} : vector<16x32xf32>, vector<32x32xf32>, vector<16x32xf32> -> vector<16x32xf32>
    %9 = arith.addf %3, %8 : vector<16x32xf32>
    %c0_8 = arith.constant 0 : index
    %c0_9 = arith.constant 0 : index
    %10 = vector.load %arg8[%c0_8, %c0_9] : memref<16x32xf32, #tpu.memory_space<vmem>>, vector<16x32xf32>
    tpu.vector_store %arg8[%c0_8, %c0_9], %9 {strides = array<i32>} : memref<16x32xf32, #tpu.memory_space<vmem>>, vector<16x32xf32>,
    %c0_i32_10 = arith.constant 0 : i32
    %11 = arith.cmpi eq, %arg3, %c0_i32_10 : i32
    %12 = arith.extui %11 : i1 to i32
    %c0_i32_11 = arith.constant 0 : i32
    %13 = arith.cmpi ne, %12, %c0_i32_11 : i32
    scf.if %13 {
      %c0_12 = arith.constant 0 : index
      %c0_13 = arith.constant 0 : index
      %14 = vector.load %arg8[%c0_12, %c0_13] : memref<16x32xf32, #tpu.memory_space<vmem>>, vector<16x32xf32>
      %c0_14 = arith.constant 0 : index
      %c0_15 = arith.constant 0 : index
      %c0_16 = arith.constant 0 : index
      %15 = vector.load %arg6[%c0_14, %c0_15, %c0_16] : memref<1x1x32xf32, #tpu.memory_space<vmem>>, vector<1x1x32xf32>
      %16 = vector.shape_cast %15 : vector<1x1x32xf32> to vector<1x32xf32>
      %17 = vector.broadcast %16 : vector<1x32xf32> to vector<16x32xf32>
      %18 = arith.addf %14, %17 : vector<16x32xf32>
      %c0_17 = arith.constant 0 : index
      %c0_18 = arith.constant 0 : index
      %c0_19 = arith.constant 0 : index
      %19 = vector.load %arg7[%c0_17, %c0_18, %c0_19] : memref<1x16x32xf32, #tpu.memory_space<vmem>>, vector<1x16x32xf32>
      %20 = vector.shape_cast %19 : vector<1x16x32xf32> to vector<16x32xf32>
      %21 = vector.shape_cast %18 : vector<16x32xf32> to vector<1x16x32xf32>
      tpu.vector_store %arg7[%c0_17, %c0_18, %c0_19], %21 {strides = array<i32>} : memref<1x16x32xf32, #tpu.memory_space<vmem>>, vector<1x16x32xf32>,
    } else {
    }
    return
  }
  func.func @transform_0(%arg0: i32, %arg1: i32, %arg2: i32, %arg3: i32) -> (i32, i32, i32) {
    %c0_i32 = arith.constant 0 : i32
    return %arg0, %arg1, %arg3 : i32, i32, i32
  }
  func.func @transform_1(%arg0: i32, %arg1: i32, %arg2: i32, %arg3: i32) -> (i32, i32, i32) {
    %c0_i32 = arith.constant 0 : i32
    return %arg0, %arg3, %arg2 : i32, i32, i32
  }
  func.func @transform_2(%arg0: i32, %arg1: i32, %arg2: i32, %arg3: i32) -> (i32, i32, i32) {
    %c0_i32 = arith.constant 0 : i32
    %c0_i32_0 = arith.constant 0 : i32
    return %arg0, %c0_i32, %arg2 : i32, i32, i32
  }
  func.func @transform_3(%arg0: i32, %arg1: i32, %arg2: i32, %arg3: i32) -> (i32, i32, i32) {
    %c0_i32 = arith.constant 0 : i32
    return %arg0, %arg1, %arg2 : i32, i32, i32
  }
}

</mosaic_0001>

<bundles_post_ra>
// kernel: squeeze.6
= control target key start
LH: loop header
LB: loop body
LE: loop exit
PB: predicated region body
PF: predicated region fallthrough
CT: control target
= control target key end

     0   :  { %vm3_vm0 = vcmask 64512   ;;  %s64_s10 = smov 120   ;;  %s65_s15 = smov 104   ;;  %s114_s0 = inlined_call_operand.vmem [shape: f32[1,16,32], index: 0, kind: input, shape index: {}]   ;;  %s115_s1 = inlined_call_operand.vmem [shape: f32[2,4,8,8], index: 1, kind: output, shape index: {}]  }
   0x1   :  { %v23_v0 = vld [vmem:[%s114_s0] sm:$0xff]   ;;  %v49_v1 = vld [vmem:[%s114_s0 + $0x8] sm:$0xff]   ;;  %s63_s0 = smov 112  }
   0x2   :  { %24 = vrot.lane.b32.xlu1 %v23_v0, %s63_s0  ;;  %11 = vrot.lane.b32.xlu0 %v23_v0, %s64_s10  ;;  %4 = vst.msk [vmem:[%s115_s1] ss:$4 sm:$0xff] %vm3_vm0, %v23_v0   ;;  %50 = vst.msk [vmem:[%s115_s1 + $0x20] ss:$4 sm:$0xff] %vm3_vm0, %v49_v1  }
   0x6   :  { %31 = vrot.lane.b32.xlu1 %v49_v1, %s63_s0  ;;  %18 = vrot.lane.b32.xlu0 %v49_v1, %s64_s10 }
   0xa   :  { %44 = vrot.lane.b32.xlu1 %v49_v1, %s65_s15  ;;  %37 = vrot.lane.b32.xlu0 %v23_v0, %s65_s15 }
  0x74   :  { %v25_v2 = vpop.permute.xlu1 %24   ;;  %v12_v3 = vpop.permute.xlu0 %11  }
  0x75   :  { %54 = vst.msk [vmem:[%s115_s1 + $0x2] ss:$4 sm:$0xff] %vm3_vm0, %v25_v2   ;;  %51 = vst.msk [vmem:[%s115_s1 + $0x1] ss:$4 sm:$0xff] %vm3_vm0, %v12_v3  }
  0x78   :  { %v32_v4 = vpop.permute.xlu1 %31   ;;  %v19_v5 = vpop.permute.xlu0 %18  }
  0x79   :  { %56 = vst.msk [vmem:[%s115_s1 + $0x22] ss:$4 sm:$0xff] %vm3_vm0, %v32_v4   ;;  %53 = vst.msk [vmem:[%s115_s1 + $0x21] ss:$4 sm:$0xff] %vm3_vm0, %v19_v5  }
  0x7c   :  { %v45_v6 = vpop.permute.xlu1 %44   ;;  %v38_v7 = vpop.permute.xlu0 %37  }
  0x7d   :  { %59 = vst.msk [vmem:[%s115_s1 + $0x23] ss:$4 sm:$0xff] %vm3_vm0, %v45_v6   ;;  %57 = vst.msk [vmem:[%s115_s1 + $0x3] ss:$4 sm:$0xff] %vm3_vm0, %v38_v7  }

// kernel: custom_multi_head_attention.5
= control target key start
LH: loop header
LB: loop body
LE: loop exit
PB: predicated region body
PF: predicated region fallthrough
CT: control target
= control target key end

     0   :  { %vm19_vm0 = vcmask 261120   ;;  %v204_v6 = vmov 0.0   ;;  %s269_s0 = inlined_call_operand.vmem [shape: f32[1,16,32], index: 0, kind: input, shape index: {}]   ;;  %s270_s1 = inlined_call_operand.vmem [shape: f32[1,32,32], index: 1, kind: input, shape index: {}]   ;;  %s271_s2 = inlined_call_operand.vmem [shape: f32[1,1,32], index: 2, kind: input, shape index: {}]   ;;  %s272_s3 = inlined_call_operand.hbm [shape: f32[1,16,32], index: 3, kind: output, shape index: {}]  }
   0x1   :  { %v26_v0 = vld [vmem:[%s270_s1] sm:$0xff]  ;;  %v27_v1 = vld [vmem:[%s270_s1 + $0x8] sm:$0xff]  ;;  %v28_v2 = vld [vmem:[%s270_s1 + $0x10] sm:$0xff]  ;;  %21 = vst.msk [vmem:[#allocation2 + $0x8] sm:$0xff] %vm19_vm0, %v204_v6 }
   0x2   :  { %v168_v3 = vpack.c.bf16 %v27_v1, %v26_v0  ;;  %v29_v4 = vld [vmem:[%s270_s1 + $0x18] sm:$0xff]  ;;  %v24_v5 = vld [vmem:[%s269_s0] sm:$0xff]  ;;  %20 = vst.msk [vmem:[#allocation2] sm:$0xff] %vm19_vm0, %v204_v6 }
   0x3   :  { %v172_v7 = vpack.c.bf16 %v29_v4, %v28_v2  ;;  %165 = vmatprep.mubr.msk.f32.mxu0 %vm19_vm0, %v24_v5 }
   0x4   :  { %8 = vsyncpa [#allocation4], 0  ;;  %169 = vmatprep.subr.bf16.mxu0 %v168_v3  ;;  %v25_v8 = vld [vmem:[%s269_s0 + $0x8] sm:$0xff]  ;;  %v150_v15 = vld [vmem:[%s271_s2] ss:$0 sm:$0xff]  ;;  %s205_s25 = smov [#allocation3]  }
   0x5   :  { %171 = vmatpush3.bf16.msra.mxu0 %v168_v3  ;;  %s137_s26 = sshll.u32 %s205_s25, 4  ;;  %s138_s26 = int_to_ptr.vmem [resolvable:$true] %s137_s26 }
   0x6   :  { %173 = vmatprep.subr.bf16.mxu0 %v172_v7  ;;  %s180_s0 = scalar_lea.vmem %s138_s26, 256  ;;  %p185_p1 = scmp.lt.s32.totalorder %s138_s26, %s138_s26 }
   0x7   :  { %p181_p0 = scmp.ne.s32.totalorder %s138_s26, %s180_s0  ;;  %p186_p2 = scmp.lt.s32.totalorder %s180_s0, %s180_s0 }
   0x8   :  { %v23_v9 = vld [vmem:[#allocation2 + $0x8] sm:$0xff] }
   0x9   :  { %175 = vmatpush3.bf16.msra.mxu0 %v172_v7  ;;  %v22_v10 = vld [vmem:[#allocation2] sm:$0xff]  ;;  %p187_p3 = por %p186_p2, %p185_p1 }
   0xb   :  { %p188_p4 = pnand %p187_p3, %p181_p0 }
   0xc   :  { %166 = vmatmul.mubr.msk.f32.vlgmr.msra.gmra.mrb[0].mxu0 %vm19_vm0, %v25_v8 }
  0xdf   :  { %v167_v11 = vpop.f32.mrb[0].mxu0 }
  0xe0   :  { %v113_v12 = vadd.f32 %v167_v11, %v23_v9  ;;  %v103_v13 = vpop.f32.mrb[1].mxu0 }
  0xe1   :  { %v112_v14 = vadd.f32 %v103_v13, %v22_v10 }
  0xe2   :  { %115 = vst.msk [vmem:[#allocation2 + $0x8] sm:$0xff] %vm19_vm0, %v113_v12 }
  0xe3   :  { %114 = vst.msk [vmem:[#allocation2] sm:$0xff] %vm19_vm0, %v112_v14 }
  0xe9   :  { %v120_v16 = vld [vmem:[#allocation2 + $0x8] sm:$0xff] }
  0xea   :  { %v119_v17 = vld [vmem:[#allocation2] sm:$0xff]  ;;  %v129_v18 = vadd.f32 %v150_v15, %v120_v16 }
  0xeb   :  { %v128_v19 = vadd.f32 %v150_v15, %v119_v17 }
  0xec   :  { %131 = vst.msk [vmem:[#allocation3 + $0x8] sm:$0xff] %vm19_vm0, %v129_v18 }
  0xed   :  { %130 = vst.msk [vmem:[#allocation3] sm:$0xff] %vm19_vm0, %v128_v19 }
  0xee   :  { %191 = shalt.err (!%p188_p4)
}
  0xef   :  { %s192_s28 = scalar_lea.hbm %s272_s3, 256 }
  0xf0   :  { %p193_p5 = scmp.ne.s32.totalorder %s272_s3, %s192_s28  ;;  %p196_p6 = scmp.lt.u32.totalorder %s192_s28, %s272_s3 }
  0xf2   :  { %p198_p7 = pnand %p196_p6, %p193_p5 }
  0xf4   :  { %201 = shalt.err (!%p198_p7)
}
  0xf5   :  { %s206_s6 = smov 128   ;;  %s207_s7 = smov 8  }
  0xf6   :  { %143 = dma.vmem_to_hbm [thread:$0]  %s138_s26, 256, %s272_s3, [#allocation4], %s206_s6, %s206_s6, %s207_s7  }
  0xf7   :  { %202 = dma.done.wait [#allocation4], 256  }
  0xf8   :  { %203 = vsyncadd [#allocation4], 4294967040 }
  0xf9   :  { %147 = vsyncpa [#allocation4], 1 }

// kernel: custom_multi_head_attention.3
= control target key start
LH: loop header
LB: loop body
LE: loop exit
PB: predicated region body
PF: predicated region fallthrough
CT: control target
= control target key end

     0   :  { %s685_s12 = smov 0   ;;  %s687_s13 = smov 0   ;;  %s737_s0 = inlined_call_operand.vmem [shape: f32[3,16,32], index: 0, kind: input, shape index: {}]   ;;  %s738_s1 = inlined_call_operand.vmem [shape: f32[3,32,32], index: 1, kind: input, shape index: {}]   ;;  %s739_s2 = inlined_call_operand.vmem [shape: f32[3,1,32], index: 2, kind: input, shape index: {}]   ;;  %s740_s3 = inlined_call_operand.vmem [shape: f32[3,16,32], index: 3, kind: output, shape index: {}]  }
   0x1   :  { %s689_s14 = smov 0  }
   0x2 LB: > { %s39_s15 = sadd.s32 1, %s658_s13  ;;  %p575_p0 = scmp.ge.s32.totalorder %s662_s14, 1  ;;  %s662_s14 = sphi %s689_s14, %s13_s14   ;;  %s658_s13 = sphi %s687_s13, %s742_s13   ;;  %s654_s12 = sphi %s685_s12, %s741_s12  }
   0x3   : > { %p41_p1 = scmp.ge.s32.totalorder %s39_s15, 3  ;;  %p214_p2 = scmp.lt.s32.totalorder %s662_s14, 4 }
   0x5   : > { %s744_s15 = smov (%p41_p1, %s39_s15), 0  ;;  %p215_p3 = pnand %p575_p0, %p214_p2 }
   0x6   : > { %p271_p4 = scmp.lt.s32.totalorder (!%p215_p3), %s654_s12, 2  ;;  %vm319_vm0 = vcmask (!%p215_p3), 261120   ;;  %v664_v0 = vmov (!%p215_p3), 0.0  }
   0x7   : > { %218 = sbr.rel (%p215_p3) target bundleno = 254 (0xfe), region = 32  ;;  %321 = vst.msk [vmem:[#allocation2 + $0x8] sm:$0xff] (!%p215_p3), %vm319_vm0, %v664_v0  ;;  %320 = vst.msk [vmem:[#allocation2] sm:$0xff] (!%p215_p3), %vm319_vm0, %v664_v0 }
   0xe   : > { %s746_s12 = smov (!%p271_p4, %s654_s12), 2  ;;  %v323_v9 = vld [vmem:[#allocation2 + $0x8] sm:$0xff]  ;;  %v322_v10 = vld [vmem:[#allocation2] sm:$0xff] }
   0xf   : > { %s588_s16 = sshll.u32 %s746_s12, 5  ;;  %s587_s20 = sshll.u32 %s746_s12, 4 }
  0x10   : > { %s294_s19 = scalar_lea.vmem %s738_s1, %s588_s16  ;;  %s281_s23 = scalar_lea.vmem %s737_s0, %s587_s20 }
  0x11   : > { %v326_v1 = vld [vmem:[%s294_s19] sm:$0xff]  ;;  %v327_v2 = vld [vmem:[%s294_s19 + $0x8] sm:$0xff]  ;;  %v328_v3 = vld [vmem:[%s294_s19 + $0x10] sm:$0xff]  ;;  %s301_s26 = scalar_lea.vmem %s739_s2, %s746_s12  ;;  %s313_s29 = scalar_lea.vmem %s740_s3, %s587_s20 }
  0x12   : > { %v607_v4 = vpack.c.bf16 %v327_v2, %v326_v1  ;;  %v329_v5 = vld [vmem:[%s294_s19 + $0x18] sm:$0xff]  ;;  %v324_v6 = vld [vmem:[%s281_s23] sm:$0xff]  ;;  %v325_v8 = vld [vmem:[%s281_s23 + $0x8] sm:$0xff] }
  0x13   : > { %v611_v7 = vpack.c.bf16 %v329_v5, %v328_v3  ;;  %604 = vmatprep.mubr.msk.f32.mxu0 %vm319_vm0, %v324_v6  ;;  %v584_v15 = vld [vmem:[%s301_s26] ss:$0 sm:$0xff] }
  0x14   : > { %608 = vmatprep.subr.bf16.mxu0 %v607_v4 }
  0x15   : > { %610 = vmatpush3.bf16.msra.mxu0 %v607_v4 }
  0x16   : > { %612 = vmatprep.subr.bf16.mxu0 %v611_v7 }
  0x19   : > { %614 = vmatpush3.bf16.msra.mxu0 %v611_v7 }
  0x1c   : > { %605 = vmatmul.mubr.msk.f32.vlgmr.msra.gmra.mrb[0].mxu0 %vm319_vm0, %v325_v8 }
  0xef   : > { %v606_v11 = vpop.f32.mrb[0].mxu0 }
  0xf0   : > { %v413_v12 = vadd.f32 %v606_v11, %v323_v9  ;;  %v403_v13 = vpop.f32.mrb[1].mxu0 }
  0xf1   : > { %v412_v14 = vadd.f32 %v403_v13, %v322_v10 }
  0xf2   : > { %415 = vst.msk [vmem:[#allocation2 + $0x8] sm:$0xff] %vm319_vm0, %v413_v12 }
  0xf3   : > { %414 = vst.msk [vmem:[#allocation2] sm:$0xff] %vm319_vm0, %v412_v14 }
  0xf9   : > { %v420_v16 = vld [vmem:[#allocation2 + $0x8] sm:$0xff] }
  0xfa   : > { %v429_v17 = vadd.f32 %v584_v15, %v420_v16  ;;  %v419_v18 = vld [vmem:[#allocation2] sm:$0xff] }
  0xfb   : > { %v428_v19 = vadd.f32 %v584_v15, %v419_v18 }
  0xfc   : > { %431 = vst.msk [vmem:[%s313_s29 + $0x8] sm:$0xff] %vm319_vm0, %v429_v17 }
  0xfd   : > { %430 = vst.msk [vmem:[%s313_s29] sm:$0xff] %vm319_vm0, %v428_v19 }
  0xfe PF: > { %s13_s14 = sadd.s32 1, %s662_s14   ;;  %s741_s12 = smov %s658_s13 }
  0xff   : > { %p10_p5 = scmp.ge.s32.totalorder %s13_s14, 5   ;;  %s742_s13 = smov %s744_s15 }
 0x101   :  { %12 = sbr.rel (!%p10_p5) target bundleno = 2 (0x2), region = 76 }

// kernel: custom_multi_head_attention.4
= control target key start
LH: loop header
LB: loop body
LE: loop exit
PB: predicated region body
PF: predicated region fallthrough
CT: control target
= control target key end

     0   :  { %s1094_s12 = smov 0   ;;  %s1171_s0 = inlined_call_operand.vmem [shape: f32[2,4,8,8], index: 0, kind: input, shape index: {}]   ;;  %s1172_s1 = inlined_call_operand.vmem [shape: f32[2,4,8,8], index: 1, kind: input, shape index: {}]   ;;  %s1173_s2 = inlined_call_operand.vmem [shape: f32[2,4,8,8], index: 2, kind: input, shape index: {}]   ;;  %s1174_s3 = inlined_call_operand.vmem [shape: f32[2,4,8,8], index: 3, kind: output, shape index: {}]  }
   0x1 LB: > { %s951_s13 = sadd.s32 4294967295, %s1070_s12   ;;  %p955_p0 = scmp.ge.s32.totalorder %s1070_s12, 1  ;;  %s1070_s12 = sphi %s1094_s12, %s13_s12  }
   0x2   : > { %p157_p1 = scmp.lt.s32.totalorder %s1070_s12, 3 }
   0x4   : > { %p158_p2 = pnand %p955_p0, %p157_p1 }
   0x5   : > { %p191_p3 = scmp.lt.s32.totalorder (!%p158_p2), %s951_s13, 1  ;;  %v1072_v0 = vmov (!%p158_p2), 0.0   ;;  %vm1073_vm0 = vmmov (!%p158_p2), 0   ;;  %vm223_vm1 = vcmask (!%p158_p2), 64512  }
   0x6   : > { %161 = sbr.rel (%p158_p2) target bundleno = 615 (0x267), region = 32  ;;  %998 = vmatprep.subr.mxu0 (!%p158_p2), %v1072_v0  ;;  %1000 = vmatprep.mubr.msk.f32.mxu0 (!%p158_p2), %vm1073_vm0, %v1072_v0 }
   0x7   : > { %1003 = vmatprep.subr.mxu1 (!%p158_p2), %v1072_v0  ;;  %1005 = vmatprep.mubr.msk.f32.mxu1 (!%p158_p2), %vm1073_vm0, %v1072_v0 }
   0xd   : > { %s1176_s13 = smov (!%p191_p3, %s951_s13), 1 }
   0xe   : > { %s1108_s14 = sshll.u32 %s1176_s13, 5 }
   0xf   : > { %s200_s17 = scalar_lea.vmem %s1172_s1, %s1108_s14  ;;  %s195_s20 = scalar_lea.vmem %s1171_s0, %s1108_s14 }
  0x10   : > { %v215_v1 = vld [vmem:[%s200_s17] sm:$0xff]  ;;  %v216_v2 = vld [vmem:[%s200_s17 + $0x8] sm:$0xff]  ;;  %v217_v5 = vld [vmem:[%s200_s17 + $0x10] sm:$0xff]  ;;  %s205_s23 = scalar_lea.vmem %s1173_s2, %s1108_s14  ;;  %s210_s26 = scalar_lea.vmem %s1174_s3, %s1108_s14 }
  0x11   : > { %999 = vmatpush3.xpose.msk.msra.mxu0 %vm223_vm1, %v215_v1  ;;  %v211_v3 = vld [vmem:[%s195_s20] sm:$0xff]  ;;  %1004 = vmatpush3.xpose.msk.msra.mxu1 %vm223_vm1, %v216_v2  ;;  %v212_v4 = vld [vmem:[%s195_s20 + $0x8] sm:$0xff]  ;;  %v218_v6 = vld [vmem:[%s200_s17 + $0x18] sm:$0xff] }
  0x12   : > { %1008 = vmatprep.subr.mxu0 %v1072_v0  ;;  %1013 = vmatprep.subr.mxu1 %v1072_v0  ;;  %v213_v7 = vld [vmem:[%s195_s20 + $0x10] sm:$0xff]  ;;  %v214_v8 = vld [vmem:[%s195_s20 + $0x18] sm:$0xff]  ;;  %v219_v25 = vld [vmem:[%s205_s23] sm:$0xff] }
  0x13   : > { %v220_v26 = vld [vmem:[%s205_s23 + $0x8] sm:$0xff]  ;;  %v221_v39 = vld [vmem:[%s205_s23 + $0x10] sm:$0xff]  ;;  %v222_v42 = vld [vmem:[%s205_s23 + $0x18] sm:$0xff] }
  0x14   : > { %1001 = vmatmul.mubr.msk.f32.vlgmr.msra.gmra.mrb[0].mxu0 %vm223_vm1, %v211_v3  ;;  %1006 = vmatmul.mubr.msk.f32.vlgmr.msra.gmra.mrb[0].mxu1 %vm223_vm1, %v212_v4 }
  0x15   : > { %1009 = vmatpush3.xpose.msk.msra.mxu0 %vm223_vm1, %v217_v5  ;;  %1010 = vmatprep.mubr.msk.f32.mxu0 %vm1073_vm0, %v1072_v0 }
  0x16   : > { %1014 = vmatpush3.xpose.msk.msra.mxu1 %vm223_vm1, %v218_v6  ;;  %1015 = vmatprep.mubr.msk.f32.mxu1 %vm1073_vm0, %v1072_v0 }
  0x17   : > { %1018 = vmatprep.subr.mxu0 %v1072_v0  ;;  %1023 = vmatprep.subr.mxu1 %v1072_v0 }
  0x18   : > { %1011 = vmatmul.mubr.msk.f32.vlgmr.msra.gmra.mrb[2].mxu0 %vm223_vm1, %v213_v7 }
  0x19   : > { %1016 = vmatmul.mubr.msk.f32.vlgmr.msra.gmra.mrb[2].mxu1 %vm223_vm1, %v214_v8  ;;  %1020 = vmatprep.mubr.msk.f32.mxu0 %vm1073_vm0, %v1072_v0 }
  0x1a   : > { %1025 = vmatprep.mubr.msk.f32.mxu1 %vm1073_vm0, %v1072_v0  ;;  %1019 = vmatpush3.msra.mxu0 %v219_v25 }
  0x1b   : > { %1028 = vmatprep.subr.mxu0 %v1072_v0  ;;  %1024 = vmatpush3.msra.mxu1 %v220_v26 }
  0x1c   : > { %1033 = vmatprep.subr.mxu1 %v1072_v0 }
  0xe7   : > { %v296_v9 = vpop.f32.mrb[0].mxu0  ;;  %v372_v10 = vpop.f32.mrb[0].mxu1 }
  0xe8   : > { %v528_v11 = vmul.f32 0.35355338, %v296_v9  ;;  %v1002_v12 = vpop.f32.mrb[1].mxu0  ;;  %v529_v13 = vmul.f32 0.35355338, %v372_v10  ;;  %v1007_v14 = vpop.f32.mrb[1].mxu1 }
  0xea   : > { %v532_v15 = vsel %vm223_vm1, %v528_v11, -inf  ;;  %v535_v20 = vsel %vm223_vm1, %v529_v13, -inf }
  0xeb   : > { %533 = vmax.xlane.f32.xlu0 %v532_v15  ;;  %v448_v16 = vpop.f32.mrb[2].mxu0 }
  0xec   : > { %v530_v17 = vmul.f32 0.35355338, %v448_v16  ;;  %v1012_v18 = vpop.f32.mrb[3].mxu0  ;;  %v524_v19 = vpop.f32.mrb[2].mxu1 }
  0xed   : > { %v531_v21 = vmul.f32 0.35355338, %v524_v19  ;;  %v1017_v22 = vpop.f32.mrb[3].mxu1 }
  0xee   : > { %v538_v23 = vsel %vm223_vm1, %v530_v17, -inf }
  0xef   : > { %536 = vmax.xlane.f32.xlu0 %v535_v20  ;;  %539 = vmax.xlane.f32.xlu1 %v538_v23  ;;  %v541_v24 = vsel %vm223_vm1, %v531_v21, -inf }
  0xf3   : > { %542 = vmax.xlane.f32.xlu1 %v541_v24 }
 0x178   : > { %v534_v27 = vpop.xlane.xlu0 %533 }
 0x179   : > { %v544_v28 = vsub.f32 %v528_v11, %v534_v27 }
 0x17b   : > { %v548_v29 = vmul.f32 1.442695, %v544_v28 }
 0x17c   : > { %v537_v30 = vpop.xlane.xlu0 %536  ;;  %v540_v31 = vpop.xlane.xlu1 %539 }
 0x17d   : > { %1048 = vpow2.f32 %v548_v29  ;;  %v545_v32 = vsub.f32 %v529_v13, %v537_v30  ;;  %v546_v33 = vsub.f32 %v530_v17, %v540_v31 }
 0x17f   : > { %v550_v34 = vmul.f32 1.442695, %v545_v32  ;;  %v552_v35 = vmul.f32 1.442695, %v546_v33 }
 0x180   : > { %v543_v36 = vpop.xlane.xlu1 %542 }
 0x181   : > { %1050 = vpow2.f32 %v550_v34  ;;  %v547_v37 = vsub.f32 %v531_v21, %v543_v36 }
 0x182   : > { %1052 = vpow2.f32 %v552_v35 }
 0x183   : > { %v554_v38 = vmul.f32 1.442695, %v547_v37 }
 0x185   : > { %1054 = vpow2.f32 %v554_v38 }
 0x187   : > { %v1049_v40 = vpop.eup %1048 }
 0x188   : > { %1021 = vmatmul.mubr.msk.f32.vlgmr.msra.gmra.mrb[4].mxu0 %vm223_vm1, %v1049_v40  ;;  %v556_v41 = vsel %vm223_vm1, %v1049_v40, 0.0 }
 0x189   : > { %557 = vadd.xlane.f32.xlu0 %v556_v41  ;;  %1029 = vmatpush3.msra.mxu0 %v221_v39 }
 0x18a   : > { %1030 = vmatprep.mubr.msk.f32.mxu0 %vm1073_vm0, %v1072_v0 }
 0x18b   : > { %v1051_v43 = vpop.eup %1050 }
 0x18c   : > { %v1053_v44 = vpop.eup %1052  ;;  %1026 = vmatmul.mubr.msk.f32.vlgmr.msra.gmra.mrb[4].mxu1 %vm223_vm1, %v1051_v43  ;;  %v559_v45 = vsel %vm223_vm1, %v1051_v43, 0.0 }
 0x18d   : > { %1031 = vmatmul.mubr.msk.f32.vlgmr.msra.gmra.mrb[6].mxu0 %vm223_vm1, %v1053_v44  ;;  %1034 = vmatpush3.msra.mxu1 %v222_v42  ;;  %v562_v46 = vsel %vm223_vm1, %v1053_v44, 0.0 }
 0x18e   : > { %560 = vadd.xlane.f32.xlu1 %v559_v45  ;;  %563 = vadd.xlane.f32.xlu0 %v562_v46 }
 0x18f   : > { %v1055_v47 = vpop.eup %1054  ;;  %1035 = vmatprep.mubr.msk.f32.mxu1 %vm1073_vm0, %v1072_v0 }
 0x190   : > { %1036 = vmatmul.mubr.msk.f32.vlgmr.msra.gmra.mrb[6].mxu1 %vm223_vm1, %v1055_v47  ;;  %v565_v48 = vsel %vm223_vm1, %v1055_v47, 0.0 }
 0x192   : > { %566 = vadd.xlane.f32.xlu1 %v565_v48 }
 0x216   : > { %v558_v49 = vpop.xlane.xlu0 %557 }
 0x217   : > { %1056 = vrcp.f32 %v558_v49 }
 0x21b   : > { %v561_v50 = vpop.xlane.xlu1 %560  ;;  %v564_v51 = vpop.xlane.xlu0 %563 }
 0x21c   : > { %1058 = vrcp.f32 %v561_v50 }
 0x21d   : > { %1060 = vrcp.f32 %v564_v51 }
 0x21f   : > { %v567_v52 = vpop.xlane.xlu1 %566 }
 0x220   : > { %1062 = vrcp.f32 %v567_v52 }
 0x221   : > { %v1057_v53 = vpop.eup %1056 }
 0x226   : > { %v1059_v57 = vpop.eup %1058 }
 0x227   : > { %v1061_v59 = vpop.eup %1060 }
 0x22a   : > { %v1063_v1 = vpop.eup %1062 }
 0x25b   : > { %v637_v54 = vpop.f32.mrb[4].mxu0 }
 0x25c   : > { %v864_v55 = vmul.f32 %v1057_v53, %v637_v54  ;;  %v1022_v56 = vpop.f32.mrb[5].mxu0 }
 0x25e   : > { %868 = vst.msk [vmem:[%s210_s26] sm:$0xff] %vm223_vm1, %v864_v55 }
 0x25f   : > { %v710_v58 = vpop.f32.mrb[4].mxu1 }
 0x260   : > { %v865_v60 = vmul.f32 %v1059_v57, %v710_v58  ;;  %v783_v61 = vpop.f32.mrb[6].mxu0  ;;  %v1027_v62 = vpop.f32.mrb[5].mxu1 }
 0x261   : > { %v866_v63 = vmul.f32 %v1061_v59, %v783_v61  ;;  %v1032_v0 = vpop.f32.mrb[7].mxu0 }
 0x262   : > { %869 = vst.msk [vmem:[%s210_s26 + $0x8] sm:$0xff] %vm223_vm1, %v865_v60 }
 0x263   : > { %870 = vst.msk [vmem:[%s210_s26 + $0x10] sm:$0xff] %vm223_vm1, %v866_v63  ;;  %v856_v2 = vpop.f32.mrb[6].mxu1 }
 0x264   : > { %v867_v3 = vmul.f32 %v1063_v1, %v856_v2  ;;  %v1037_v4 = vpop.f32.mrb[7].mxu1 }
 0x266   : > { %871 = vst.msk [vmem:[%s210_s26 + $0x18] sm:$0xff] %vm223_vm1, %v867_v3 }
 0x267 PF: > { %s13_s12 = sadd.s32 1, %s1070_s12  }
 0x268   : > { %p10_p4 = scmp.ge.s32.totalorder %s13_s12, 4  }
 0x26a   :  { %12 = sbr.rel (!%p10_p4) target bundleno = 1 (0x1), region = 68 }

</bundles_post_ra>
